<compile_context>
chip_gen: v6e
topology: v6e:2x2x1
jax: 0.10.0
libtpu: 0.0.40
codegen_flags: <defaults>
</compile_context>

<pallas_src>
import math

import numpy as np

import jax
import jax.numpy as jnp
from jax.experimental import pallas as pl
from jax.experimental.pallas import tpu as pltpu

# MultiDiscrete action space with 10 sub-actions (synthetic, deterministic).
NVEC = (3, 3, 4, 11, 11, 8, 5, 2, 2, 2)
NUM_HEADS = len(NVEC)
TOTAL = sum(NVEC)                       # 51 real output columns
HEAD_PAD = 128                          # one lane-width slab holds all heads
OFFSETS = tuple(sum(NVEC[:h]) for h in range(NUM_HEADS))
NEG = -1e30                             # "blocked" additive gate for the max scan


def _build_constants():
    """Static segment-id vector and same-segment 0/1 matrix (numpy, host-side)."""
    seg = np.full((1, HEAD_PAD), -1, dtype=np.int32)
    for h, n in enumerate(NVEC):
        seg[0, OFFSETS[h]:OFFSETS[h] + n] = h
    same = (seg[0][:, None] == seg[0][None, :]) & (seg[0][:, None] >= 0)
    return jnp.asarray(seg), jnp.asarray(same.astype(np.float32))


SEG_IDS, SEG_MAT = _build_constants()   # (1,128) int32, (128,128) f32


def _affector_kernel(x1_ref, x2_ref, w_ref, b_ref, seg_ref, smat_ref, o_ref):
    """Packed logits + exact per-head (segmented) softmax in one invocation.

    x1_ref, x2_ref : (BS, E)    f32 state features (cast to bf16 in-kernel)
    w_ref          : (2E, 128)  bf16 packed weights (heads side-by-side)
    b_ref          : (1, 128)   f32 packed bias (pad lanes = 0)
    seg_ref        : (1, 128)   int32 segment id per lane (-1 = pad lane)
    smat_ref       : (128, 128) f32 same-segment 0/1 matrix
    o_ref          : (BS, 128)  f32 packed softmax probabilities (pad lanes = 0)
    """
    e = x1_ref.shape[1]

    # MXU matmuls: bf16 inputs (cast on the VPU, in-kernel), f32 accumulation.
    x1 = x1_ref[...].astype(jnp.bfloat16)
    x2 = x2_ref[...].astype(jnp.bfloat16)
    logits = jnp.dot(x1, w_ref[pl.ds(0, e), :], preferred_element_type=jnp.float32)
    logits = logits + jnp.dot(x2, w_ref[pl.ds(e, e), :],
                              preferred_element_type=jnp.float32)
    logits = logits + b_ref[...]                       # (1,128) broadcast over BS

    seg = seg_ref[...]                                 # (1,128) int32
    valid_f = jnp.where(seg >= 0, 1.0, 0.0)            # (1,128) f32: 1 real, 0 pad

    # Exact per-head max via log-step segmented scans in both lane directions.
    # Gates come from rolling the segment ids with the *same* pltpu.roll call,
    # so correctness does not depend on the roll direction convention.
    lo = logits
    hi = logits
    for k in range(4):                                 # shifts 1, 2, 4, 8 (>= max head width 11)
        s = 1 << k
        gate_lo = jnp.where(pltpu.roll(seg, shift=s, axis=1) == seg, 0.0, NEG)
        lo = jnp.maximum(lo, pltpu.roll(lo, shift=s, axis=1) + gate_lo)
        s2 = HEAD_PAD - s                              # opposite rotation
        gate_hi = jnp.where(pltpu.roll(seg, shift=s2, axis=1) == seg, 0.0, NEG)
        hi = jnp.maximum(hi, pltpu.roll(hi, shift=s2, axis=1) + gate_hi)
    maxb = jnp.maximum(lo, hi)                         # per-lane segment max

    # Numerator (f32 exp on the EUP); pad lanes forced to exactly 0.
    p = jnp.exp(logits - maxb) * valid_f               # (BS,128) f32

    # Segmented sum, broadcast back into place, in ONE f32 MXU matmul.
    denom = jnp.dot(p, smat_ref[...], preferred_element_type=jnp.float32)
    denom = denom + (1.0 - valid_f)                    # pad lanes: 0 -> 1 (no 1/0)

    o_ref[...] = p * pl.reciprocal(denom, approx=True)


def _cost_estimate(bs, e):
    flops = 2 * bs * (2 * e) * HEAD_PAD + 2 * bs * HEAD_PAD * HEAD_PAD
    transcendentals = 2 * bs * HEAD_PAD                # exp + reciprocal
    bytes_accessed = (2 * bs * e * 4                   # x1, x2 (f32)
                      + 2 * e * HEAD_PAD * 2           # w (bf16)
                      + HEAD_PAD * 4                   # b
                      + HEAD_PAD * 4                   # seg ids
                      + HEAD_PAD * HEAD_PAD * 4        # segment matrix
                      + bs * HEAD_PAD * 4)             # output
    return pl.CostEstimate(flops=flops, transcendentals=transcendentals,
                           bytes_accessed=bytes_accessed)


def inverse_dynamics_forward_packed(x1, x2, w, b):
    """Fast path. x1, x2: (BS, E) f32. w: (2E, 128) bf16. b: (1, 128) f32.

    Returns the lane-dense packed (BS, 128) slab of per-head probabilities
    (head h lives in lanes OFFSETS[h] : OFFSETS[h] + NVEC[h]; pad lanes = 0).
    """
    bs, e = x1.shape
    return pl.pallas_call(
        _affector_kernel,
        out_shape=jax.ShapeDtypeStruct((bs, HEAD_PAD), jnp.float32),
        in_specs=[pl.BlockSpec(memory_space=pltpu.MemorySpace.VMEM)] * 6,
        out_specs=pl.BlockSpec(memory_space=pltpu.MemorySpace.VMEM),
        cost_estimate=_cost_estimate(bs, e),
    )(x1, x2, w, b, SEG_IDS, SEG_MAT)


def unpack_heads(packed):
    """Split the packed slab into the module's 10 per-head distributions."""
    return tuple(packed[:, OFFSETS[h]:OFFSETS[h] + n] for h, n in enumerate(NVEC))


def inverse_dynamics_forward(x1, x2, w, b):
    """Module-parity API (tuple of 10 tensors). Perf-sensitive callers should
    consume the packed slab from inverse_dynamics_forward_packed directly."""
    return unpack_heads(inverse_dynamics_forward_packed(x1, x2, w, b))


def reference_forward(x1, x2, w, b):
    """Pure-JAX reference with the same bf16 matmul path (for validation)."""
    e = x1.shape[1]
    logits = (
        jnp.dot(x1.astype(jnp.bfloat16), w[:e], preferred_element_type=jnp.float32)
        + jnp.dot(x2.astype(jnp.bfloat16), w[e:], preferred_element_type=jnp.float32)
        + b
    )
    return tuple(
        jax.nn.softmax(logits[:, OFFSETS[h]:OFFSETS[h] + n], axis=-1)
        for h, n in enumerate(NVEC)
    )


def init_params(embed_dim, key):
    """Deterministic synthetic parameters for LinearAffector(2*embed_dim, nvec),
    packed: heads side-by-side along a single 128-lane column."""
    two_e = 2 * embed_dim
    keys = jax.random.split(key, 2 * NUM_HEADS)
    w = jnp.zeros((two_e, HEAD_PAD), jnp.float32)
    b = jnp.zeros((1, HEAD_PAD), jnp.float32)
    for h, n in enumerate(NVEC):
        off = OFFSETS[h]
        wk = jax.random.normal(keys[h], (two_e, n), jnp.float32) / math.sqrt(two_e)
        bk = jax.random.normal(keys[NUM_HEADS + h], (n,), jnp.float32) * 0.01
        w = w.at[:, off:off + n].set(wk)
        b = b.at[0, off:off + n].set(bk)
    return w.astype(jnp.bfloat16), b


# TODO(synk): start_monitoring()/forward hooks are host-side instrumentation
# with no Pallas equivalent; omitted.

if __name__ == "__main__":
    embed_dim = 32
    batch = 4

    key = jax.random.PRNGKey(0)
    k1, k2, kp = jax.random.split(key, 3)
    x1 = jax.random.normal(k1, (batch, embed_dim), jnp.float32)
    x2 = jax.random.normal(k2, (batch, embed_dim), jnp.float32)
    w, b = init_params(embed_dim, kp)

    fwd = jax.jit(inverse_dynamics_forward_packed)
    packed = jax.block_until_ready(fwd(x1, x2, w, b))

    dists = unpack_heads(packed)                     # host-side glue only
    ref = reference_forward(x1, x2, w, b)

    # Sanity: 10 heads, correct shapes, finite, rows sum to ~1, match reference.
    assert len(dists) == NUM_HEADS
    for d, r, n in zip(dists, ref, NVEC):
        assert d.shape == (batch, n)
        assert bool(jnp.all(jnp.isfinite(d)))
        assert jnp.allclose(jnp.sum(d, axis=-1), 1.0, atol=5e-3)
        assert jnp.allclose(d, r, atol=5e-3)
    # Pad lanes must be exactly zero (lane-dense packed output contract).
    assert bool(jnp.all(packed[:, TOTAL:] == 0.0))

    print("KERNEL_OK")
</pallas_src>

<mosaic_0001>
module attributes {stable_mosaic.version = 11 : i64} {
  func.func @_affector_kernel(%arg0: memref<4x32xf32, #tpu.memory_space<vmem>>, %arg1: memref<4x32xf32, #tpu.memory_space<vmem>>, %arg2: memref<64x128xbf16, #tpu.memory_space<vmem>>, %arg3: memref<1x128xf32, #tpu.memory_space<vmem>>, %arg4: memref<1x128xi32, #tpu.memory_space<vmem>>, %arg5: memref<128x128xf32, #tpu.memory_space<vmem>>, %arg6: memref<4x128xf32, #tpu.memory_space<vmem>>) attributes {dimension_semantics = [], scalar_prefetch = 0 : i64, scratch_operands = 0 : i64, tpu.core_type = #tpu.core_type<tc>} {
    %c0 = arith.constant 0 : index
    %c0_0 = arith.constant 0 : index
    %0 = vector.load %arg0[%c0, %c0_0] : memref<4x32xf32, #tpu.memory_space<vmem>>, vector<4x32xf32>
    %1 = arith.truncf %0 : vector<4x32xf32> to vector<4x32xbf16>
    %c0_1 = arith.constant 0 : index
    %c0_2 = arith.constant 0 : index
    %2 = vector.load %arg1[%c0_1, %c0_2] : memref<4x32xf32, #tpu.memory_space<vmem>>, vector<4x32xf32>
    %3 = arith.truncf %2 : vector<4x32xf32> to vector<4x32xbf16>
    %c0_3 = arith.constant 0 : index
    %c0_4 = arith.constant 0 : index
    %4 = vector.load %arg2[%c0_3, %c0_4] : memref<64x128xbf16, #tpu.memory_space<vmem>>, vector<32x128xbf16>
    %cst = arith.constant dense<0.000000e+00> : vector<4x128xf32>
    %5 = tpu.matmul %1, %4, %cst {dimension_numbers = #tpu.dot_dimension_numbers<[1], [0], [0], [1], [0, 0, 1, 1], [], []>} : vector<4x32xbf16>, vector<32x128xbf16>, vector<4x128xf32> -> vector<4x128xf32>
    %c32 = arith.constant 32 : index
    %c0_5 = arith.constant 0 : index
    %6 = vector.load %arg2[%c32, %c0_5] : memref<64x128xbf16, #tpu.memory_space<vmem>>, vector<32x128xbf16>
    %cst_6 = arith.constant dense<0.000000e+00> : vector<4x128xf32>
    %7 = tpu.matmul %3, %6, %cst_6 {dimension_numbers = #tpu.dot_dimension_numbers<[1], [0], [0], [1], [0, 0, 1, 1], [], []>} : vector<4x32xbf16>, vector<32x128xbf16>, vector<4x128xf32> -> vector<4x128xf32>
    %8 = arith.addf %5, %7 : vector<4x128xf32>
    %c0_7 = arith.constant 0 : index
    %c0_8 = arith.constant 0 : index
    %9 = vector.load %arg3[%c0_7, %c0_8] : memref<1x128xf32, #tpu.memory_space<vmem>>, vector<1x128xf32>
    %10 = vector.broadcast %9 : vector<1x128xf32> to vector<4x128xf32>
    %11 = arith.addf %8, %10 : vector<4x128xf32>
    %c0_9 = arith.constant 0 : index
    %c0_10 = arith.constant 0 : index
    %12 = vector.load %arg4[%c0_9, %c0_10] : memref<1x128xi32, #tpu.memory_space<vmem>>, vector<1x128xi32>
    %c0_i32 = arith.constant 0 : i32
    %13 = vector.broadcast %c0_i32 : i32 to vector<1x128xi32>
    %14 = arith.cmpi sge, %12, %13 : vector<1x128xi32>
    %cst_11 = arith.constant 1.000000e+00 : f32
    %cst_12 = arith.constant 0.000000e+00 : f32
    %15 = vector.broadcast %cst_11 : f32 to vector<1x128xf32>
    %16 = vector.broadcast %cst_12 : f32 to vector<1x128xf32>
    %17 = arith.select %14, %15, %16 : vector<1x128xi1>, vector<1x128xf32>
    %c1_i32 = arith.constant 1 : i32
    %18 = tpu.dynamic_rotate %12 by %c1_i32 dim 1 : vector<1x128xi32>, i32 -> vector<1x128xi32>
    %19 = arith.cmpi eq, %18, %12 : vector<1x128xi32>
    %cst_13 = arith.constant 0.000000e+00 : f32
    %cst_14 = arith.constant -1.000000e+30 : f32
    %20 = vector.broadcast %cst_13 : f32 to vector<1x128xf32>
    %21 = vector.broadcast %cst_14 : f32 to vector<1x128xf32>
    %22 = arith.select %19, %20, %21 : vector<1x128xi1>, vector<1x128xf32>
    %c1_i32_15 = arith.constant 1 : i32
    %23 = tpu.dynamic_rotate %11 by %c1_i32_15 dim 1 : vector<4x128xf32>, i32 -> vector<4x128xf32>
    %24 = vector.broadcast %22 : vector<1x128xf32> to vector<4x128xf32>
    %25 = arith.addf %23, %24 : vector<4x128xf32>
    %26 = arith.maximumf %11, %25 : vector<4x128xf32>
    %c127_i32 = arith.constant 127 : i32
    %27 = tpu.dynamic_rotate %12 by %c127_i32 dim 1 : vector<1x128xi32>, i32 -> vector<1x128xi32>
    %28 = arith.cmpi eq, %27, %12 : vector<1x128xi32>
    %cst_16 = arith.constant 0.000000e+00 : f32
    %cst_17 = arith.constant -1.000000e+30 : f32
    %29 = vector.broadcast %cst_16 : f32 to vector<1x128xf32>
    %30 = vector.broadcast %cst_17 : f32 to vector<1x128xf32>
    %31 = arith.select %28, %29, %30 : vector<1x128xi1>, vector<1x128xf32>
    %c127_i32_18 = arith.constant 127 : i32
    %32 = tpu.dynamic_rotate %11 by %c127_i32_18 dim 1 : vector<4x128xf32>, i32 -> vector<4x128xf32>
    %33 = vector.broadcast %31 : vector<1x128xf32> to vector<4x128xf32>
    %34 = arith.addf %32, %33 : vector<4x128xf32>
    %35 = arith.maximumf %11, %34 : vector<4x128xf32>
    %c2_i32 = arith.constant 2 : i32
    %36 = tpu.dynamic_rotate %12 by %c2_i32 dim 1 : vector<1x128xi32>, i32 -> vector<1x128xi32>
    %37 = arith.cmpi eq, %36, %12 : vector<1x128xi32>
    %cst_19 = arith.constant 0.000000e+00 : f32
    %cst_20 = arith.constant -1.000000e+30 : f32
    %38 = vector.broadcast %cst_19 : f32 to vector<1x128xf32>
    %39 = vector.broadcast %cst_20 : f32 to vector<1x128xf32>
    %40 = arith.select %37, %38, %39 : vector<1x128xi1>, vector<1x128xf32>
    %c2_i32_21 = arith.constant 2 : i32
    %41 = tpu.dynamic_rotate %26 by %c2_i32_21 dim 1 : vector<4x128xf32>, i32 -> vector<4x128xf32>
    %42 = vector.broadcast %40 : vector<1x128xf32> to vector<4x128xf32>
    %43 = arith.addf %41, %42 : vector<4x128xf32>
    %44 = arith.maximumf %26, %43 : vector<4x128xf32>
    %c126_i32 = arith.constant 126 : i32
    %45 = tpu.dynamic_rotate %12 by %c126_i32 dim 1 : vector<1x128xi32>, i32 -> vector<1x128xi32>
    %46 = arith.cmpi eq, %45, %12 : vector<1x128xi32>
    %cst_22 = arith.constant 0.000000e+00 : f32
    %cst_23 = arith.constant -1.000000e+30 : f32
    %47 = vector.broadcast %cst_22 : f32 to vector<1x128xf32>
    %48 = vector.broadcast %cst_23 : f32 to vector<1x128xf32>
    %49 = arith.select %46, %47, %48 : vector<1x128xi1>, vector<1x128xf32>
    %c126_i32_24 = arith.constant 126 : i32
    %50 = tpu.dynamic_rotate %35 by %c126_i32_24 dim 1 : vector<4x128xf32>, i32 -> vector<4x128xf32>
    %51 = vector.broadcast %49 : vector<1x128xf32> to vector<4x128xf32>
    %52 = arith.addf %50, %51 : vector<4x128xf32>
    %53 = arith.maximumf %35, %52 : vector<4x128xf32>
    %c4_i32 = arith.constant 4 : i32
    %54 = tpu.dynamic_rotate %12 by %c4_i32 dim 1 : vector<1x128xi32>, i32 -> vector<1x128xi32>
    %55 = arith.cmpi eq, %54, %12 : vector<1x128xi32>
    %cst_25 = arith.constant 0.000000e+00 : f32
    %cst_26 = arith.constant -1.000000e+30 : f32
    %56 = vector.broadcast %cst_25 : f32 to vector<1x128xf32>
    %57 = vector.broadcast %cst_26 : f32 to vector<1x128xf32>
    %58 = arith.select %55, %56, %57 : vector<1x128xi1>, vector<1x128xf32>
    %c4_i32_27 = arith.constant 4 : i32
    %59 = tpu.dynamic_rotate %44 by %c4_i32_27 dim 1 : vector<4x128xf32>, i32 -> vector<4x128xf32>
    %60 = vector.broadcast %58 : vector<1x128xf32> to vector<4x128xf32>
    %61 = arith.addf %59, %60 : vector<4x128xf32>
    %62 = arith.maximumf %44, %61 : vector<4x128xf32>
    %c124_i32 = arith.constant 124 : i32
    %63 = tpu.dynamic_rotate %12 by %c124_i32 dim 1 : vector<1x128xi32>, i32 -> vector<1x128xi32>
    %64 = arith.cmpi eq, %63, %12 : vector<1x128xi32>
    %cst_28 = arith.constant 0.000000e+00 : f32
    %cst_29 = arith.constant -1.000000e+30 : f32
    %65 = vector.broadcast %cst_28 : f32 to vector<1x128xf32>
    %66 = vector.broadcast %cst_29 : f32 to vector<1x128xf32>
    %67 = arith.select %64, %65, %66 : vector<1x128xi1>, vector<1x128xf32>
    %c124_i32_30 = arith.constant 124 : i32
    %68 = tpu.dynamic_rotate %53 by %c124_i32_30 dim 1 : vector<4x128xf32>, i32 -> vector<4x128xf32>
    %69 = vector.broadcast %67 : vector<1x128xf32> to vector<4x128xf32>
    %70 = arith.addf %68, %69 : vector<4x128xf32>
    %71 = arith.maximumf %53, %70 : vector<4x128xf32>
    %c8_i32 = arith.constant 8 : i32
    %72 = tpu.dynamic_rotate %12 by %c8_i32 dim 1 : vector<1x128xi32>, i32 -> vector<1x128xi32>
    %73 = arith.cmpi eq, %72, %12 : vector<1x128xi32>
    %cst_31 = arith.constant 0.000000e+00 : f32
    %cst_32 = arith.constant -1.000000e+30 : f32
    %74 = vector.broadcast %cst_31 : f32 to vector<1x128xf32>
    %75 = vector.broadcast %cst_32 : f32 to vector<1x128xf32>
    %76 = arith.select %73, %74, %75 : vector<1x128xi1>, vector<1x128xf32>
    %c8_i32_33 = arith.constant 8 : i32
    %77 = tpu.dynamic_rotate %62 by %c8_i32_33 dim 1 : vector<4x128xf32>, i32 -> vector<4x128xf32>
    %78 = vector.broadcast %76 : vector<1x128xf32> to vector<4x128xf32>
    %79 = arith.addf %77, %78 : vector<4x128xf32>
    %80 = arith.maximumf %62, %79 : vector<4x128xf32>
    %c120_i32 = arith.constant 120 : i32
    %81 = tpu.dynamic_rotate %12 by %c120_i32 dim 1 : vector<1x128xi32>, i32 -> vector<1x128xi32>
    %82 = arith.cmpi eq, %81, %12 : vector<1x128xi32>
    %cst_34 = arith.constant 0.000000e+00 : f32
    %cst_35 = arith.constant -1.000000e+30 : f32
    %83 = vector.broadcast %cst_34 : f32 to vector<1x128xf32>
    %84 = vector.broadcast %cst_35 : f32 to vector<1x128xf32>
    %85 = arith.select %82, %83, %84 : vector<1x128xi1>, vector<1x128xf32>
    %c120_i32_36 = arith.constant 120 : i32
    %86 = tpu.dynamic_rotate %71 by %c120_i32_36 dim 1 : vector<4x128xf32>, i32 -> vector<4x128xf32>
    %87 = vector.broadcast %85 : vector<1x128xf32> to vector<4x128xf32>
    %88 = arith.addf %86, %87 : vector<4x128xf32>
    %89 = arith.maximumf %71, %88 : vector<4x128xf32>
    %90 = arith.maximumf %80, %89 : vector<4x128xf32>
    %91 = arith.subf %11, %90 : vector<4x128xf32>
    %92 = math.exp %91 : vector<4x128xf32>
    %93 = vector.broadcast %17 : vector<1x128xf32> to vector<4x128xf32>
    %94 = arith.mulf %92, %93 : vector<4x128xf32>
    %c0_37 = arith.constant 0 : index
    %c0_38 = arith.constant 0 : index
    %95 = vector.load %arg5[%c0_37, %c0_38] : memref<128x128xf32, #tpu.memory_space<vmem>>, vector<128x128xf32>
    %cst_39 = arith.constant dense<0.000000e+00> : vector<4x128xf32>
    %96 = tpu.matmul %94, %95, %cst_39 {dimension_numbers = #tpu.dot_dimension_numbers<[1], [0], [0], [1], [0, 0, 1, 1], [], []>} : vector<4x128xf32>, vector<128x128xf32>, vector<4x128xf32> -> vector<4x128xf32>
    %cst_40 = arith.constant 1.000000e+00 : f32
    %97 = vector.broadcast %cst_40 : f32 to vector<1x128xf32>
    %98 = arith.subf %97, %17 : vector<1x128xf32>
    %99 = vector.broadcast %98 : vector<1x128xf32> to vector<4x128xf32>
    %100 = arith.addf %96, %99 : vector<4x128xf32>
    %101 = tpu.reciprocal %100 {approx = true} : vector<4x128xf32> -> vector<4x128xf32>
    %102 = arith.mulf %94, %101 : vector<4x128xf32>
    %c0_41 = arith.constant 0 : index
    %c0_42 = arith.constant 0 : index
    %103 = vector.load %arg6[%c0_41, %c0_42] : memref<4x128xf32, #tpu.memory_space<vmem>>, vector<4x128xf32>
    tpu.vector_store %arg6[%c0_41, %c0_42], %102 {strides = array<i32>} : memref<4x128xf32, #tpu.memory_space<vmem>>, vector<4x128xf32>,
    return
  }
}

</mosaic_0001>

<bundles_post_ra>
// kernel: inverse_dynamics_forward_packed.1
= control target key start
LH: loop header
LB: loop body
LE: loop exit
PB: predicated region body
PF: predicated region fallthrough
CT: control target
= control target key end

     0   :  { %11 = vsyncpa [#allocation3], 0  ;;  %s802_s0 = inlined_call_operand.hbm [shape: f32[4,32], index: 0, kind: input, shape index: {}]   ;;  %s803_s1 = inlined_call_operand.hbm [shape: f32[4,32], index: 1, kind: input, shape index: {}]   ;;  %s804_s2 = inlined_call_operand.hbm [shape: bf16[64,128], index: 2, kind: input, shape index: {}]   ;;  %s805_s3 = inlined_call_operand.vmem [shape: f32[1,128], index: 3, kind: input, shape index: {}]   ;;  %s806_s4 = inlined_call_operand.vmem [shape: s32[1,128], index: 4, kind: input, shape index: {}]   ;;  %s807_s5 = inlined_call_operand.hbm [shape: f32[128,128], index: 5, kind: input, shape index: {}]   ;;  %s808_s6 = inlined_call_operand.hbm [shape: f32[4,128], index: 6, kind: output, shape index: {}]  }
   0x1   :  { %12 = vsyncpa [#allocation6], 0 }
   0x2   :  { %13 = vsyncpa [#allocation9], 0 }
   0x3   :  { %14 = vsyncpa [#allocation4], 0  ;;  %s645_s21 = smov [#allocation5]   ;;  %s646_s23 = smov [#allocation2]  }
   0x4   :  { %s31_s22 = sshll.u32 %s645_s21, 4  ;;  %s21_s24 = sshll.u32 %s646_s23, 4  ;;  %s32_s22 = int_to_ptr.vmem [resolvable:$true] %s31_s22  ;;  %s22_s24 = int_to_ptr.vmem [resolvable:$true] %s21_s24 }
   0x5   :  { %s545_s25 = scalar_lea.vmem %s32_s22, 64  ;;  %p550_p1 = scmp.lt.s32.totalorder %s32_s22, %s32_s22 }
   0x6   :  { %p546_p0 = scmp.ne.s32.totalorder %s32_s22, %s545_s25  ;;  %p551_p2 = scmp.lt.s32.totalorder %s545_s25, %s545_s25 }
   0x8   :  { %p552_p3 = por %p551_p2, %p550_p1 }
   0xa   :  { %p553_p4 = pnand %p552_p3, %p546_p0 }
   0xc   :  { %556 = shalt.err (!%p553_p4)
}
   0xd   :  { %34 = dma.hbm_to_vmem [thread:$0]  %s803_s1, 64, %s32_s22, [#allocation6]  }
   0xe   :  { %s565_s28 = scalar_lea.vmem %s22_s24, 64  ;;  %p570_p6 = scmp.lt.s32.totalorder %s22_s24, %s22_s24 }
   0xf   :  { %p566_p5 = scmp.ne.s32.totalorder %s22_s24, %s565_s28  ;;  %p571_p7 = scmp.lt.s32.totalorder %s565_s28, %s565_s28 }
  0x11   :  { %p572_p8 = por %p571_p7, %p570_p6 }
  0x13   :  { %p573_p9 = pnand %p572_p8, %p566_p5 }
  0x15   :  { %576 = shalt.err (!%p573_p9)
}
  0x16   :  { %24 = dma.hbm_to_vmem [thread:$0]  %s802_s0, 64, %s22_s24, [#allocation3]  }
  0x17   :  { %s647_s7 = smov [#allocation7]  }
  0x18   :  { %s40_s8 = sshll.u32 %s647_s7, 4  ;;  %s41_s8 = int_to_ptr.vmem [resolvable:$true] %s40_s8 }
  0x19   :  { %s585_s9 = scalar_lea.vmem %s41_s8, 512  ;;  %p590_p11 = scmp.lt.s32.totalorder %s41_s8, %s41_s8 }
  0x1a   :  { %p586_p10 = scmp.ne.s32.totalorder %s41_s8, %s585_s9  ;;  %p591_p12 = scmp.lt.s32.totalorder %s585_s9, %s585_s9 }
  0x1c   :  { %p592_p13 = por %p591_p12, %p590_p11 }
  0x1e   :  { %p593_p0 = pnand %p592_p13, %p586_p10 }
  0x20   :  { %596 = shalt.err (!%p593_p0)
}
  0x21   :  { %s648_s1 = smov 64   ;;  %s649_s10 = smov 4  }
  0x22   :  { %46 = dma.hbm_to_vmem [thread:$0]  %s804_s2, 512, %s41_s8, [#allocation6], %s648_s1, %s648_s1, %s649_s10  }
  0x23   :  { %s650_s13 = smov [#allocation8]  }
  0x24   :  { %s56_s14 = sshll.u32 %s650_s13, 4  ;;  %s57_s14 = int_to_ptr.vmem [resolvable:$true] %s56_s14 }
  0x25   :  { %s605_s0 = scalar_lea.vmem %s57_s14, 2048  ;;  %p610_p2 = scmp.lt.s32.totalorder %s57_s14, %s57_s14 }
  0x26   :  { %p606_p1 = scmp.ne.s32.totalorder %s57_s14, %s605_s0  ;;  %p611_p3 = scmp.lt.s32.totalorder %s605_s0, %s605_s0 }
  0x28   :  { %p612_p4 = por %p611_p3, %p610_p2 }
  0x2a   :  { %p613_p5 = pnand %p612_p4, %p606_p1 }
  0x2c   :  { %616 = shalt.err (!%p613_p5)
}
  0x2d   :  { %s651_s15 = smov 128   ;;  %s652_s16 = smov 8  }
  0x2e   :  { %62 = dma.hbm_to_vmem [thread:$0]  %s807_s5, 2048, %s57_s14, [#allocation9], %s651_s15, %s651_s15, %s652_s16  }
  0x2f   :  { %637 = dma.done.wait [#allocation3], 64  }
  0x30   :  { %638 = vsyncadd [#allocation3], 4294967232 }
  0x31   :  { %639 = dma.done.wait [#allocation6], 576  }
  0x32   :  { %640 = vsyncadd [#allocation6], 4294966720 }
  0x33   :  { %641 = dma.done.wait [#allocation9], 2048  }
  0x34   :  { %642 = vsyncadd [#allocation9], 4294965248  ;;  %v653_v0 = vmov 0.0   ;;  %vm654_vm0 = vmmov 0   ;;  %v529_v1 = vld [vmem:[#allocation7 + $0x18] sm:$0xff]   ;;  %v530_v2 = vld [vmem:[#allocation7 + $0x10] sm:$0xff]   ;;  %v216_v21 = vlaneseq }
  0x35   :  { %460 = vmatprep.subr.bf16.mxu1 %v653_v0  ;;  %464 = vmatprep.mubr.msk.bf16.mxu1 %vm654_vm0, %v653_v0  ;;  %v78_v3 = vld [vmem:[#allocation5] sm:$0xf]  ;;  %vm100_vm1 = vcmask 261120   ;;  %v531_v5 = vld [vmem:[#allocation7 + $0x8] sm:$0xff]   ;;  %v532_v6 = vld [vmem:[#allocation7] sm:$0xff]   ;;  %s655_s19 = smov 1  }
  0x36   :  { %476 = vmatprep.subr.mxu0 %v653_v0  ;;  %508 = vmatprep.mubr.msk.f32.mxu0 %vm654_vm0, %v653_v0  ;;  %v79_v4 = vpack.c.bf16 %v78_v3, %v78_v3  ;;  %v76_v7 = vld [vmem:[#allocation2] sm:$0xf]  ;;  %s656_s20 = smov 127   ;;  %s657_s21 = smov 2   ;;  %v217_v23 = vshrl.u32 %v216_v21, 7  ;;  %v331_v52 = vld [vmem:[#allocation8 + $0x70] sm:$0xff] }
  0x37   :  { %461 = vmatpush3.bf16.msra.mxu1 %v529_v1  ;;  %v77_v8 = vpack.c.bf16 %v76_v7, %v76_v7  ;;  %v726_v9 = vld [vmem:[%s806_s4] sm:$0x1]  ;;  %s658_s4 = smov 126   ;;  %v659_v26 = vmov -1e+30   ;;  %s661_s24 = smov 120  }
  0x38   :  { %462 = vmatprep.subr.bf16.mxu1 %v653_v0  ;;  %210 = vrot.lane.b32.xlu0 %v726_v9, %s655_s19  ;;  %v436_v15 = vld [vmem:[%s805_s3] ss:$0 sm:$0xff]  ;;  %v741_v25 = vsub.s32 0, %v217_v23  ;;  %s660_s3 = smov 124   ;;  %v330_v54 = vld [vmem:[#allocation8 + $0x68] sm:$0xff]  ;;  %v329_v55 = vld [vmem:[#allocation8 + $0x60] sm:$0xff] }
  0x39   :  { %v332_v43 = vld [vmem:[#allocation8 + $0x78] sm:$0xff]  ;;  %v327_v60 = vld [vmem:[#allocation8 + $0x50] sm:$0xff]  ;;  %v326_v63 = vld [vmem:[#allocation8 + $0x48] sm:$0xff]  ;;  %vm208_vm10 = vcmp.ge.s32.totalorder %v726_v9, 0  ;;  %s662_s25 = smov [#allocation10]  }
  0x3a   :  { %477 = vmatpush3.msra.mxu0 %v332_v43  ;;  %v328_v58 = vld [vmem:[#allocation8 + $0x58] sm:$0xff]  ;;  %v325_v3 = vld [vmem:[#allocation8 + $0x40] sm:$0xff]  ;;  %s419_s26 = sshll.u32 %s662_s25, 4  ;;  %s420_s26 = int_to_ptr.vmem [resolvable:$true] %s419_s26 }
  0x3b   :  { %463 = vmatpush3.bf16.msra.mxu1 %v530_v2  ;;  %478 = vmatprep.subr.mxu0 %v653_v0  ;;  %s617_s27 = scalar_lea.vmem %s420_s26, 64  ;;  %p622_p7 = scmp.lt.s32.totalorder %s420_s26, %s420_s26 }
  0x3c   :  { %468 = vmatprep.subr.bf16.mxu1 %v653_v0  ;;  %222 = vrot.lane.b32.xlu0 %v726_v9, %s656_s20  ;;  %p618_p6 = scmp.ne.s32.totalorder %s420_s26, %s617_s27  ;;  %p623_p8 = scmp.lt.s32.totalorder %s617_s27, %s617_s27 }
  0x3d   :  { %479 = vmatpush3.msra.mxu0 %v331_v52 }
  0x3e   :  { %465 = vmatmul.mubr.msk.bf16.vlgmr.msra.gmra.mxu1 %vm100_vm1, %v79_v4  ;;  %480 = vmatprep.subr.mxu0 %v653_v0  ;;  %p624_p9 = por %p623_p8, %p622_p7 }
  0x3f   :  { %469 = vmatpush3.bf16.msra.mxu1 %v531_v5  ;;  %472 = vmatprep.mubr.msk.bf16.mxu1 %vm654_vm0, %v653_v0  ;;  %v324_v5 = vld [vmem:[#allocation8 + $0x38] sm:$0xff] }
  0x40   :  { %470 = vmatprep.subr.bf16.mxu1 %v653_v0  ;;  %234 = vrot.lane.b32.xlu0 %v726_v9, %s657_s21  ;;  %p625_p10 = pnand %p624_p9, %p618_p6 }
  0x41   :  { %481 = vmatpush3.msra.mxu0 %v330_v54 }
  0x42   :  { %482 = vmatprep.subr.mxu0 %v653_v0 }
  0x43   :  { %471 = vmatpush3.bf16.msra.mxu1 %v532_v6  ;;  %483 = vmatpush3.msra.mxu0 %v329_v55  ;;  %v323_v6 = vld [vmem:[#allocation8 + $0x30] sm:$0xff] }
  0x44   :  { %484 = vmatprep.subr.mxu0 %v653_v0 }
  0x45   :  { %485 = vmatpush3.msra.mxu0 %v328_v58 }
  0x46   :  { %473 = vmatmul.mubr.msk.bf16.vlgmr.msra.gmra.mxu1 %vm100_vm1, %v77_v8  ;;  %486 = vmatprep.subr.mxu0 %v653_v0  ;;  %v322_v8 = vld [vmem:[#allocation8 + $0x28] sm:$0xff] }
  0x47   :  { %487 = vmatpush3.msra.mxu0 %v327_v60 }
  0x48   :  { %488 = vmatprep.subr.mxu0 %v653_v0 }
  0x49   :  { %489 = vmatpush3.msra.mxu0 %v326_v63 }
  0x4a   :  { %490 = vmatprep.subr.mxu0 %v653_v0 }
  0x4b   :  { %491 = vmatpush3.msra.mxu0 %v325_v3 }
  0x4c   :  { %492 = vmatprep.subr.mxu0 %v653_v0 }
  0x4d   :  { %493 = vmatpush3.msra.mxu0 %v324_v5 }
  0x4e   :  { %494 = vmatprep.subr.mxu0 %v653_v0 }
  0x4f   :  { %495 = vmatpush3.msra.mxu0 %v323_v6 }
  0x50   :  { %496 = vmatprep.subr.mxu0 %v653_v0 }
  0x51   :  { %497 = vmatpush3.msra.mxu0 %v322_v8 }
  0x52   :  { %498 = vmatprep.subr.mxu0 %v653_v0 }
  0xaa   :  { %v211_v22 = vpop.permute.xlu0 %210 }
  0xab   :  { %vm212_vm2 = vcmp.eq.s32.totalorder %v211_v22, %v726_v9 }
  0xac   :  { %v213_v27 = vsel %vm212_vm2, 0.0, %v659_v26 }
  0xad   :  { %v219_v28 = vrot.slane %v213_v27, %v741_v25 }
  0xae   :  { %v223_v24 = vpop.permute.xlu0 %222 }
  0xaf   :  { %vm224_vm3 = vcmp.eq.s32.totalorder %v223_v24, %v726_v9 }
  0xb0   :  { %v225_v29 = vsel %vm224_vm3, 0.0, %v659_v26 }
  0xb1   :  { %v231_v32 = vrot.slane %v225_v29, %v741_v25 }
  0xb2   :  { %v235_v37 = vpop.permute.xlu0 %234 }
  0xb3   :  { %vm236_vm4 = vcmp.eq.s32.totalorder %v235_v37, %v726_v9 }
  0xb4   :  { %v237_v39 = vsel %vm236_vm4, 0.0, %v659_v26 }
  0xb5   :  { %v243_v40 = vrot.slane %v237_v39, %v741_v25 }
  0xfe   :  { %v138_v10 = vpop.f32.mrf.mxu1 }
 0x100   :  { %v466_v11 = vpop.f32.mrf.mxu1 }
 0x101   :  { %v320_v11 = vld [vmem:[#allocation8 + $0x18] sm:$0xff] }
 0x102   :  { %v141_v12 = vpop.f32.mrf.mxu1 }
 0x103   :  { %v319_v12 = vld [vmem:[#allocation8 + $0x10] sm:$0xff] }
 0x104   :  { %v467_v13 = vpop.f32.mrf.mxu1 }
 0x105   :  { %v318_v13 = vld [vmem:[#allocation8 + $0x8] sm:$0xff] }
 0x106   :  { %v193_v14 = vpop.f32.mrf.mxu1 }
 0x107   :  { %v194_v16 = vadd.f32 %v193_v14, %v138_v10  ;;  %v321_v10 = vld [vmem:[#allocation8 + $0x20] sm:$0xff] }
 0x108   :  { %v474_v17 = vpop.f32.mrf.mxu1  ;;  %499 = vmatpush3.msra.mxu0 %v321_v10  ;;  %v317_v14 = vld [vmem:[#allocation8] sm:$0xff] }
 0x109   :  { %v735_v18 = vadd.f32 %v436_v15, %v194_v16  ;;  %500 = vmatprep.subr.mxu0 %v653_v0 }
 0x10a   :  { %v196_v19 = vpop.f32.mrf.mxu1  ;;  %501 = vmatpush3.msra.mxu0 %v320_v11 }
 0x10b   :  { %214 = vrot.lane.b32.xlu1 %v735_v18, %s655_s19  ;;  %502 = vmatprep.subr.mxu0 %v653_v0 }
 0x10c   :  { %v475_v20 = vpop.f32.mrf.mxu1  ;;  %503 = vmatpush3.msra.mxu0 %v319_v12 }
 0x10d   :  { %504 = vmatprep.subr.mxu0 %v653_v0 }
 0x10e   :  { %505 = vmatpush3.msra.mxu0 %v318_v13 }
 0x10f   :  { %226 = vrot.lane.b32.xlu1 %v735_v18, %s656_s20  ;;  %506 = vmatprep.subr.mxu0 %v653_v0 }
 0x110   :  { %507 = vmatpush3.msra.mxu0 %v317_v14 }
 0x113   :  { %246 = vrot.lane.b32.xlu1 %v726_v9, %s658_s4 }
 0x17d   :  { %v215_v30 = vpop.permute.xlu1 %214 }
 0x17e   :  { %v220_v31 = vadd.f32 %v219_v28, %v215_v30 }
 0x180   :  { %v221_v33 = vmax.f32 %v735_v18, %v220_v31 }
 0x181   :  { %v227_v34 = vpop.permute.xlu1 %226 }
 0x182   :  { %v232_v35 = vadd.f32 %v231_v32, %v227_v34  ;;  %238 = vrot.lane.b32.xlu0 %v221_v33, %s657_s21 }
 0x184   :  { %v233_v36 = vmax.f32 %v735_v18, %v232_v35 }
 0x185   :  { %v247_v38 = vpop.permute.xlu1 %246 }
 0x186   :  { %250 = vrot.lane.b32.xlu1 %v233_v36, %s658_s4  ;;  %258 = vrot.lane.b32.xlu0 %v726_v9, %s649_s10  ;;  %vm248_vm5 = vcmp.eq.s32.totalorder %v247_v38, %v726_v9 }
 0x187   :  { %v249_v41 = vsel %vm248_vm5, 0.0, %v659_v26 }
 0x188   :  { %v255_v45 = vrot.slane %v249_v41, %v741_v25 }
 0x18a   :  { %270 = vrot.lane.b32.xlu1 %v726_v9, %s660_s3 }
 0x1f4   :  { %v239_v42 = vpop.permute.xlu0 %238 }
 0x1f5   :  { %v244_v44 = vadd.f32 %v243_v40, %v239_v42 }
 0x1f7   :  { %v245_v46 = vmax.f32 %v221_v33, %v244_v44  ;;  %v209_v33 = vsel %vm208_vm10, 1.0, %v653_v0 }
 0x1f8   :  { %v251_v47 = vpop.permute.xlu1 %250  ;;  %v259_v50 = vpop.permute.xlu0 %258 }
 0x1f9   :  { %v256_v48 = vadd.f32 %v255_v45, %v251_v47  ;;  %262 = vrot.lane.b32.xlu0 %v245_v46, %s649_s10  ;;  %vm260_vm6 = vcmp.eq.s32.totalorder %v259_v50, %v726_v9 }
 0x1fa   :  { %v261_v53 = vsel %vm260_vm6, 0.0, %v659_v26 }
 0x1fb   :  { %v257_v49 = vmax.f32 %v233_v36, %v256_v48  ;;  %v267_v56 = vrot.slane %v261_v53, %v741_v25  ;;  %v333_v36 = vsub.f32 1.0, %v209_v33 }
 0x1fc   :  { %v271_v51 = vpop.permute.xlu1 %270 }
 0x1fd   :  { %274 = vrot.lane.b32.xlu1 %v257_v49, %s660_s3  ;;  %282 = vrot.lane.b32.xlu0 %v726_v9, %s652_s16  ;;  %vm272_vm7 = vcmp.eq.s32.totalorder %v271_v51, %v726_v9  ;;  %v338_v37 = vrot.slane %v333_v36, %v741_v25 }
 0x1fe   :  { %v273_v57 = vsel %vm272_vm7, 0.0, %v659_v26 }
 0x1ff   :  { %v279_v62 = vrot.slane %v273_v57, %v741_v25 }
 0x201   :  { %294 = vrot.lane.b32.xlu1 %v726_v9, %s661_s24 }
 0x26b   :  { %v263_v59 = vpop.permute.xlu0 %262 }
 0x26c   :  { %v268_v61 = vadd.f32 %v267_v56, %v263_v59 }
 0x26e   :  { %v269_v1 = vmax.f32 %v245_v46, %v268_v61 }
 0x26f   :  { %v275_v2 = vpop.permute.xlu1 %274  ;;  %v283_v15 = vpop.permute.xlu0 %282 }
 0x270   :  { %v280_v4 = vadd.f32 %v279_v62, %v275_v2  ;;  %286 = vrot.lane.b32.xlu0 %v269_v1, %s652_s16  ;;  %vm284_vm8 = vcmp.eq.s32.totalorder %v283_v15, %v726_v9 }
 0x271   :  { %v285_v17 = vsel %vm284_vm8, 0.0, %v659_v26 }
 0x272   :  { %v281_v7 = vmax.f32 %v257_v49, %v280_v4  ;;  %v291_v20 = vrot.slane %v285_v17, %v741_v25 }
 0x273   :  { %v295_v16 = vpop.permute.xlu1 %294 }
 0x274   :  { %298 = vrot.lane.b32.xlu1 %v281_v7, %s661_s24  ;;  %vm296_vm9 = vcmp.eq.s32.totalorder %v295_v16, %v726_v9 }
 0x275   :  { %v297_v19 = vsel %vm296_vm9, 0.0, %v659_v26  ;;  %v314_v26 = vrot.slane %v209_v33, %v741_v25 }
 0x276   :  { %v303_v22 = vrot.slane %v297_v19, %v741_v25 }
 0x2e2   :  { %v287_v21 = vpop.permute.xlu0 %286 }
 0x2e3   :  { %v292_v23 = vadd.f32 %v291_v20, %v287_v21 }
 0x2e5   :  { %v293_v28 = vmax.f32 %v269_v1, %v292_v23 }
 0x2e6   :  { %v299_v24 = vpop.permute.xlu1 %298 }
 0x2e7   :  { %v304_v27 = vadd.f32 %v303_v22, %v299_v24 }
 0x2e9   :  { %v305_v29 = vmax.f32 %v281_v7, %v304_v27 }
 0x2eb   :  { %v306_v30 = vmax.f32 %v293_v28, %v305_v29 }
 0x2ed   :  { %v307_v31 = vsub.f32 %v735_v18, %v306_v30 }
 0x2ef   :  { %v308_v32 = vmul.f32 1.442695, %v307_v31 }
 0x2f1   :  { %533 = vpow2.f32 %v308_v32 }
 0x2fe   :  { %v534_v34 = vpop.eup %533 }
 0x2ff   :  { %v316_v35 = vmul.f32 %v534_v34, %v314_v26 }
 0x301   :  { %509 = vmatmul.mubr.f32.vlgmr.msra.gmra.mxu0 %v316_v35 }
 0x3c1   :  { %v406_v38 = vpop.f32.mrf.mxu0 }
 0x3c2   :  { %v407_v39 = vadd.f32 %v406_v38, %v338_v37 }
 0x3c3   :  { %v510_v40 = vpop.f32.mrf.mxu0 }
 0x3c4   :  { %535 = vrcp.f32 %v407_v39 }
 0x3d1   :  { %v536_v18 = vpop.eup %535 }
 0x3d2   :  { %v411_v41 = vmul.f32 %v536_v18, %v316_v35 }
 0x3d4   :  { %412 = vst [vmem:[#allocation10] sm:$0xf] %v411_v41 }
 0x3d5   :  { %628 = shalt.err (!%p625_p10)
}
 0x3d6   :  { %422 = dma.vmem_to_hbm [thread:$0]  %s420_s26, 64, %s808_s6, [#allocation4]  }
 0x3d7   :  { %643 = dma.done.wait [#allocation4], 64  }
 0x3d8   :  { %644 = vsyncadd [#allocation4], 4294967232 }
 0x3d9   :  { %426 = vsyncpa [#allocation3], 1 }
 0x3da   :  { %427 = vsyncpa [#allocation6], 1 }
 0x3db   :  { %428 = vsyncpa [#allocation9], 1 }
 0x3dc   :  { %429 = vsyncpa [#allocation4], 1 }

</bundles_post_ra>
